<compile_context>
chip_gen: v5e
topology: v5e:2x2
jax: 0.10.0
libtpu: 0.0.40
codegen_flags: <defaults>
</compile_context>

<pallas_src>
import jax
import jax.numpy as jnp
from jax.experimental import pallas as pl
from jax.experimental.pallas import tpu as pltpu

WIN = 5
PAD = WIN // 2
LANE = 128


def _spatial_distangle_kernel(y_ref, out_ref, vpad_ref):
    # y_ref:    (H+4, W+4, TN)  y block, spatial halos pre-zero-padded, B*C
    #                           (zero-padded) channels on the 128-lane axis.
    # out_ref:  (1, 8, 128)     f32 partial-sum tile for this program.
    # vpad_ref: (H, W+4, TN)    f32 scratch: vertical 5-tap sums over padded W.
    HP, WP, TN = y_ref.shape
    H = HP - 2 * PAD
    W = WP - 2 * PAD

    # |y| over the whole padded block; f32 math throughout (v5e has no bf16
    # VALU and the reduction wants f32 anyway).
    ap = jnp.abs(y_ref[...]).astype(jnp.float32)                 # (HP, WP, TN)

    # ---- vertical 5-tap pass (leading/major axis): in-register value slices,
    #      log-step shift-add tree (3 adds instead of 4). ----
    t1 = ap[0:H + 3] + ap[1:H + 4]                               # (H+3, WP, TN)
    v = t1[0:H] + t1[2:H + 2] + ap[4:H + 4]                      # (H,   WP, TN)
    vpad_ref[...] = v

    # ---- horizontal 5-tap pass (sublane axis): shifted ref loads. ----
    # TODO(synk): this pass could also use the log-step tree (needs sublane
    # value slices or a second scratch); kept as 5 plain ref loads for
    # lowering robustness.
    box = vpad_ref[:, 0:W, :]
    for dj in range(1, WIN):
        box = box + vpad_ref[:, dj:dj + W, :]                    # (H, W, TN)

    # ---- loss partial: center tap removed algebraically via a*(box - a). ----
    a = jnp.abs(y_ref[PAD:PAD + H, PAD:PAD + W, :]).astype(jnp.float32)
    partial = jnp.sum(a * (box - a))

    # Lane-dense (8,128) partial tile per program; reduced in the wrapper.
    out_ref[...] = jnp.full(out_ref.shape, partial, jnp.float32)


def _tiling(H, W, N, in_itemsize):
    """Lane-tile size, grid size and VMEM limit derived from chip VMEM."""
    HP, WP = H + 2 * PAD, W + 2 * PAD
    try:
        vmem_cap = int(pltpu.get_tpu_info().vmem_capacity_bytes)
    except Exception:
        vmem_cap = 64 * 1024 * 1024      # conservative fallback: v7x per-core VMEM
    # Per lane-column footprint: double-buffered input block + ~6 block-sized
    # f32 intermediates (|y|, tree temps, vertical-sum scratch, box, a).
    per_lane = HP * WP * (2 * in_itemsize + 6 * 4)
    budget = int(vmem_cap * 0.4)
    n_lanes_needed = -(-N // LANE) * LANE
    tn = max(1, budget // (per_lane * LANE)) * LANE
    tn = int(min(tn, n_lanes_needed))
    # TODO(synk): add H-strip tiling for very large H*W, where even a 128-lane
    # block exceeds the budget (matters first on v7x's 64 MiB VMEM).
    grid = -(-N // tn)
    footprint = per_lane * tn + 2 * 8 * LANE * 4
    vmem_limit = int(min(vmem_cap * 0.9, max(footprint + (8 << 20), 32 << 20)))
    return tn, grid, vmem_limit


def spatial_distangle_loss(y_norm):
    B, C, H, W = y_norm.shape
    N = B * C
    TN, G, vmem_limit = _tiling(H, W, N, jnp.dtype(y_norm.dtype).itemsize)
    N_pad = G * TN
    HP, WP = H + 2 * PAD, W + 2 * PAD

    # Layout plumbing (one fused XLA transpose+pad): channels-last so the
    # 128-lane axis carries B*C; spatial halos pre-zeroed; channel axis padded
    # with zeros up to the lane tile (zeros contribute nothing to the loss).
    yt = jnp.transpose(y_norm, (2, 3, 0, 1)).reshape(H, W, N)
    yp = jnp.pad(yt, ((PAD, PAD), (PAD, PAD), (0, N_pad - N)))

    # TODO(synk): for H,W >= ~128 on v6e/v7x the box filter could run on the
    # (currently idle) MXU via banded all-ones matrices; not profitable here.
    partials = pl.pallas_call(
        _spatial_distangle_kernel,
        out_shape=jax.ShapeDtypeStruct((G, 8, LANE), jnp.float32),
        grid_spec=pltpu.PrefetchScalarGridSpec(
            num_scalar_prefetch=0,
            grid=(G,),
            in_specs=[pl.BlockSpec((HP, WP, TN), lambda g: (0, 0, g))],
            out_specs=pl.BlockSpec((1, 8, LANE), lambda g: (g, 0, 0)),
            scratch_shapes=[pltpu.VMEM((H, WP, TN), jnp.float32)],
        ),
        compiler_params=pltpu.CompilerParams(
            dimension_semantics=("parallel",),
            vmem_limit_bytes=vmem_limit,
        ),
    )(yp)

    total = jnp.sum(partials[:, 0, 0])
    # / window_size**2 (per relation_map) and / (H*W*B)
    return total / (WIN ** 2 * H * W * B)


def _reference_loss(y):
    # Pure-JAX reference mirroring the PyTorch forward (unfold == shifted
    # zero-padded views; |a*b| == |a|*|b|).
    B, C, H, W = y.shape
    a = jnp.abs(y.astype(jnp.float32))
    apad = jnp.pad(a, ((0, 0), (0, 0), (PAD, PAD), (PAD, PAD)))
    s = jnp.zeros_like(a)
    for di in range(WIN):
        for dj in range(WIN):
            if di == PAD and dj == PAD:
                continue
            s = s + apad[:, :, di:di + H, dj:dj + W]
    return jnp.sum(a * s) / (WIN ** 2 * H * W * B)


if __name__ == "__main__":
    # SpatialDistangleLoss(window_size=5) has no learnable parameters.
    key = jax.random.PRNGKey(0)
    B, C, H, W = 2, 4, 16, 16
    y_norm = jax.random.normal(key, (B, C, H, W), dtype=jnp.float32)

    loss = jax.block_until_ready(spatial_distangle_loss(y_norm))
    ref = jax.block_until_ready(_reference_loss(y_norm))
    assert jnp.allclose(loss, ref, rtol=1e-4, atol=1e-6), (float(loss), float(ref))

    print("KERNEL_OK")
</pallas_src>

<mosaic_0001>
module attributes {stable_mosaic.version = 11 : i64} {
  func.func @_spatial_distangle_kernel(%arg0: i32, %arg1: memref<20x20x128xf32, #tpu.memory_space<vmem>>, %arg2: memref<1x8x128xf32, #tpu.memory_space<vmem>>, %arg3: memref<16x20x128xf32, #tpu.memory_space<vmem>>) attributes {dimension_semantics = [#tpu.dimension_semantics<parallel>], iteration_bounds = array<i64: 1>, scalar_prefetch = 0 : i64, scratch_operands = 1 : i64, tpu.core_type = #tpu.core_type<tc>, window_params = [{transform_indices = @transform_0, window_bounds = array<i64: 20, 20, 128>}, {transform_indices = @transform_1, window_bounds = array<i64: 1, 8, 128>}]} {
    %c0 = arith.constant 0 : index
    %c0_0 = arith.constant 0 : index
    %c0_1 = arith.constant 0 : index
    %0 = vector.load %arg1[%c0, %c0_0, %c0_1] : memref<20x20x128xf32, #tpu.memory_space<vmem>>, vector<20x20x128xf32>
    %1 = math.absf %0 : vector<20x20x128xf32>
    %2 = vector.extract_strided_slice %1 {offsets = [0, 0, 0], sizes = [19, 20, 128], strides = [1, 1, 1]} : vector<20x20x128xf32> to vector<19x20x128xf32>
    %3 = vector.extract_strided_slice %1 {offsets = [1, 0, 0], sizes = [19, 20, 128], strides = [1, 1, 1]} : vector<20x20x128xf32> to vector<19x20x128xf32>
    %4 = arith.addf %2, %3 : vector<19x20x128xf32>
    %5 = vector.extract_strided_slice %4 {offsets = [0, 0, 0], sizes = [16, 20, 128], strides = [1, 1, 1]} : vector<19x20x128xf32> to vector<16x20x128xf32>
    %6 = vector.extract_strided_slice %4 {offsets = [2, 0, 0], sizes = [16, 20, 128], strides = [1, 1, 1]} : vector<19x20x128xf32> to vector<16x20x128xf32>
    %7 = arith.addf %5, %6 : vector<16x20x128xf32>
    %8 = vector.extract_strided_slice %1 {offsets = [4, 0, 0], sizes = [16, 20, 128], strides = [1, 1, 1]} : vector<20x20x128xf32> to vector<16x20x128xf32>
    %9 = arith.addf %7, %8 : vector<16x20x128xf32>
    %c0_2 = arith.constant 0 : index
    %c0_3 = arith.constant 0 : index
    %c0_4 = arith.constant 0 : index
    %10 = vector.load %arg3[%c0_2, %c0_3, %c0_4] : memref<16x20x128xf32, #tpu.memory_space<vmem>>, vector<16x20x128xf32>
    tpu.vector_store %arg3[%c0_2, %c0_3, %c0_4], %9 {strides = array<i32>} : memref<16x20x128xf32, #tpu.memory_space<vmem>>, vector<16x20x128xf32>,
    %c0_5 = arith.constant 0 : index
    %c0_6 = arith.constant 0 : index
    %c0_7 = arith.constant 0 : index
    %11 = vector.load %arg3[%c0_5, %c0_6, %c0_7] : memref<16x20x128xf32, #tpu.memory_space<vmem>>, vector<16x16x128xf32>
    %c0_8 = arith.constant 0 : index
    %c1 = arith.constant 1 : index
    %c0_9 = arith.constant 0 : index
    %12 = vector.load %arg3[%c0_8, %c1, %c0_9] : memref<16x20x128xf32, #tpu.memory_space<vmem>>, vector<16x16x128xf32>
    %13 = arith.addf %11, %12 : vector<16x16x128xf32>
    %c0_10 = arith.constant 0 : index
    %c2 = arith.constant 2 : index
    %c0_11 = arith.constant 0 : index
    %14 = vector.load %arg3[%c0_10, %c2, %c0_11] : memref<16x20x128xf32, #tpu.memory_space<vmem>>, vector<16x16x128xf32>
    %15 = arith.addf %13, %14 : vector<16x16x128xf32>
    %c0_12 = arith.constant 0 : index
    %c3 = arith.constant 3 : index
    %c0_13 = arith.constant 0 : index
    %16 = vector.load %arg3[%c0_12, %c3, %c0_13] : memref<16x20x128xf32, #tpu.memory_space<vmem>>, vector<16x16x128xf32>
    %17 = arith.addf %15, %16 : vector<16x16x128xf32>
    %c0_14 = arith.constant 0 : index
    %c4 = arith.constant 4 : index
    %c0_15 = arith.constant 0 : index
    %18 = vector.load %arg3[%c0_14, %c4, %c0_15] : memref<16x20x128xf32, #tpu.memory_space<vmem>>, vector<16x16x128xf32>
    %19 = arith.addf %17, %18 : vector<16x16x128xf32>
    %c2_16 = arith.constant 2 : index
    %c2_17 = arith.constant 2 : index
    %c0_18 = arith.constant 0 : index
    %20 = vector.load %arg1[%c2_16, %c2_17, %c0_18] : memref<20x20x128xf32, #tpu.memory_space<vmem>>, vector<16x16x128xf32>
    %21 = math.absf %20 : vector<16x16x128xf32>
    %22 = arith.subf %19, %21 : vector<16x16x128xf32>
    %23 = arith.mulf %21, %22 : vector<16x16x128xf32>
    %24 = vector.shape_cast %23 : vector<16x16x128xf32> to vector<1x16x16x128xf32>
    %cst = arith.constant dense<0.000000e+00> : vector<1xf32>
    %25 = vector.multi_reduction <add>, %24, %cst [1, 2, 3] : vector<1x16x16x128xf32> to vector<1xf32>
    %26 = vector.shape_cast %25 : vector<1xf32> to vector<1x1x1x1xf32>
    %27 = vector.extract %26[0, 0, 0, 0] : f32 from vector<1x1x1x1xf32>
    %28 = vector.broadcast %27 : f32 to vector<1x8x128xf32>
    %c0_19 = arith.constant 0 : index
    %c0_20 = arith.constant 0 : index
    %c0_21 = arith.constant 0 : index
    %29 = vector.load %arg2[%c0_19, %c0_20, %c0_21] : memref<1x8x128xf32, #tpu.memory_space<vmem>>, vector<1x8x128xf32>
    tpu.vector_store %arg2[%c0_19, %c0_20, %c0_21], %28 {strides = array<i32>} : memref<1x8x128xf32, #tpu.memory_space<vmem>>, vector<1x8x128xf32>,
    return
  }
  func.func @transform_0(%arg0: i32) -> (i32, i32, i32) {
    %c0_i32 = arith.constant 0 : i32
    %c0_i32_0 = arith.constant 0 : i32
    %c0_i32_1 = arith.constant 0 : i32
    return %c0_i32, %c0_i32_0, %arg0 : i32, i32, i32
  }
  func.func @transform_1(%arg0: i32) -> (i32, i32, i32) {
    %c0_i32 = arith.constant 0 : i32
    %c0_i32_0 = arith.constant 0 : i32
    %c0_i32_1 = arith.constant 0 : i32
    return %arg0, %c0_i32, %c0_i32_0 : i32, i32, i32
  }
}

</mosaic_0001>

<bundles_post_ra>
// kernel: tpu_custom_call.1
= control target key start
LH: loop header
LB: loop body
LE: loop exit
PB: predicated region body
PF: predicated region fallthrough
CT: control target
= control target key end

     0   :  { %6 = vsyncpa [#allocation4], 0  ;;  %s1106_s0 = inlined_call_operand.hbm [shape: f32[20,20,128], index: 0, kind: input, shape index: {}]   ;;  %s1107_s1 = inlined_call_operand.hbm [shape: f32[1,8,128], index: 1, kind: output, shape index: {}]  }
   0x1   :  { %7 = vsyncpa [#allocation5], 0  ;;  %s12_s8 = sshll.u32 %s1106_s0, 4  ;;  %s877_s9 = smov [#allocation3]   ;;  %s13_s8 = int_to_ptr.hbm [resolvable:$true] %s12_s8 }
   0x2   :  { %s14_s10 = sshll.u32 %s877_s9, 4  ;;  %s878_s11 = smov 128   ;;  %s15_s10 = int_to_ptr.vmem [resolvable:$true] %s14_s10 }
   0x3   :  { %s879_s12 = smov 8  }
   0x4   :  { %20 = dma.hbm_to_vmem [thread:$0]  %s13_s8, 7680, %s15_s10, [#allocation4], %s878_s11, %s878_s11, %s879_s12  }
   0x5   :  { %873 = dma.done.wait [#allocation4], 7680  }
   0x6   :  { %874 = vsyncadd [#allocation4], 4294959616  ;;  %v25_v0 = vld [vmem:[#allocation3] sm:$0xff]  ;;  %v26_v1 = vld [vmem:[#allocation3 + $0x8] sm:$0xff]  ;;  %s880_s0 = smov [#allocation6]   ;;  %s809_s16 = sshll.u32 %s1107_s1, 4  ;;  %s810_s16 = int_to_ptr.hbm [resolvable:$true] %s809_s16 }
   0x7   :  { %v27_v2 = vld [vmem:[#allocation3 + $0x10] sm:$0xf]  ;;  %v28_v3 = vld [vmem:[#allocation3 + $0x18] sm:$0xff]  ;;  %v29_v4 = vld [vmem:[#allocation3 + $0x20] sm:$0xff]  ;;  %v85_v8 = vand.u32 2147483647, %v25_v0 }
   0x8   :  { %v30_v5 = vld [vmem:[#allocation3 + $0x28] sm:$0xf]  ;;  %v31_v6 = vld [vmem:[#allocation3 + $0x30] sm:$0xff]  ;;  %v32_v9 = vld [vmem:[#allocation3 + $0x38] sm:$0xff]  ;;  %v86_v12 = vand.u32 2147483647, %v26_v1 }
   0x9   :  { %v34_v7 = vld [vmem:[#allocation3 + $0x48] sm:$0xff]  ;;  %v33_v10 = vld [vmem:[#allocation3 + $0x40] sm:$0xf]  ;;  %v35_v11 = vld [vmem:[#allocation3 + $0x50] sm:$0xff]  ;;  %v87_v15 = vand.u32 2147483647, %v27_v2 }
   0xa   :  { %v36_v13 = vld [vmem:[#allocation3 + $0x58] sm:$0xf]  ;;  %v37_v14 = vld [vmem:[#allocation3 + $0x60] sm:$0xff]  ;;  %v88_v16 = vand.u32 2147483647, %v28_v3  ;;  %v38_v35 = vld [vmem:[#allocation3 + $0x68] sm:$0xff] }
   0xb   :  { %v91_v17 = vand.u32 2147483647, %v31_v6  ;;  %v94_v18 = vand.u32 2147483647, %v34_v7  ;;  %v89_v19 = vand.u32 2147483647, %v29_v4 }
   0xc   :  { %v92_v20 = vand.u32 2147483647, %v32_v9  ;;  %v95_v21 = vand.u32 2147483647, %v35_v11  ;;  %v90_v22 = vand.u32 2147483647, %v30_v5  ;;  %v145_v26 = vadd.f32 %v88_v16, %v85_v8 }
   0xd   :  { %v93_v23 = vand.u32 2147483647, %v33_v10  ;;  %v96_v24 = vand.u32 2147483647, %v36_v13  ;;  %v97_v25 = vand.u32 2147483647, %v37_v14  ;;  %v151_v27 = vadd.f32 %v94_v18, %v91_v17 }
   0xe   :  { %v146_v28 = vadd.f32 %v89_v19, %v86_v12  ;;  %v152_v29 = vadd.f32 %v95_v21, %v92_v20  ;;  %v147_v30 = vadd.f32 %v90_v22, %v87_v15  ;;  %v39_v32 = vld [vmem:[#allocation3 + $0x70] sm:$0xf]  ;;  %v148_v33 = vadd.f32 %v91_v17, %v88_v16  ;;  %v40_v36 = vld [vmem:[#allocation3 + $0x78] sm:$0xff]  ;;  %v41_v48 = vld [vmem:[#allocation3 + $0x80] sm:$0xff]  ;;  %s807_s13 = sshll.u32 %s880_s0, 4  ;;  %s808_s13 = int_to_ptr.vmem [resolvable:$true] %s807_s13 }
   0xf   :  { %v153_v31 = vadd.f32 %v96_v24, %v93_v23  ;;  %v154_v34 = vadd.f32 %v97_v25, %v94_v18  ;;  %v199_v37 = vadd.f32 %v151_v27, %v145_v26  ;;  %v99_v39 = vand.u32 2147483647, %v39_v32  ;;  %v42_v49 = vld [vmem:[#allocation3 + $0x88] sm:$0xf]  ;;  %v43_v50 = vld [vmem:[#allocation3 + $0x90] sm:$0xff]  ;;  %v44_v51 = vld [vmem:[#allocation3 + $0x98] sm:$0xff] }
  0x10   :  { %v200_v38 = vadd.f32 %v152_v29, %v146_v28  ;;  %v98_v41 = vand.u32 2147483647, %v38_v35  ;;  %v100_v42 = vand.u32 2147483647, %v40_v36  ;;  %v101_v52 = vand.u32 2147483647, %v41_v48 }
  0x11   :  { %v201_v40 = vadd.f32 %v153_v31, %v147_v30  ;;  %v202_v43 = vadd.f32 %v154_v34, %v148_v33  ;;  %v894_v44 = vadd.f32 %v199_v37, %v97_v25  ;;  %v45_v53 = vld [vmem:[#allocation3 + $0xa0] sm:$0xf]  ;;  %v102_v54 = vand.u32 2147483647, %v42_v49  ;;  %v46_v55 = vld [vmem:[#allocation3 + $0xa8] sm:$0xff]  ;;  %v47_v57 = vld [vmem:[#allocation3 + $0xb0] sm:$0xff] }
  0x12   :  { %v896_v45 = vadd.f32 %v200_v38, %v98_v41  ;;  %v103_v56 = vand.u32 2147483647, %v43_v50  ;;  %v104_v58 = vand.u32 2147483647, %v44_v51  ;;  %v149_v59 = vadd.f32 %v92_v20, %v89_v19  ;;  %v48_v62 = vld [vmem:[#allocation3 + $0xb8] sm:$0xf] }
  0x13   :  { %v249_v46 = vadd.f32 %v201_v40, %v99_v39  ;;  %v898_v47 = vadd.f32 %v202_v43, %v100_v42  ;;  %295 = vst [vmem:[#allocation2] sm:$0xff] %v894_v44  ;;  %v150_v60 = vadd.f32 %v93_v23, %v90_v22  ;;  %v155_v61 = vadd.f32 %v98_v41, %v95_v21  ;;  %v49_v63 = vld [vmem:[#allocation3 + $0xc0] sm:$0xff]  ;;  %v50_v6 = vld [vmem:[#allocation3 + $0xc8] sm:$0xff]  ;;  %v51_v7 = vld [vmem:[#allocation3 + $0xd0] sm:$0xf] }
  0x14   :  { %296 = vst [vmem:[#allocation2 + $0x8] sm:$0xff] %v896_v45  ;;  %v105_v0 = vand.u32 2147483647, %v45_v53  ;;  %v156_v1 = vadd.f32 %v99_v39, %v96_v24  ;;  %v157_v2 = vadd.f32 %v100_v42, %v97_v25  ;;  %v158_v3 = vadd.f32 %v101_v52, %v98_v41  ;;  %v52_v10 = vld [vmem:[#allocation3 + $0xd8] sm:$0xff]  ;;  %v53_v11 = vld [vmem:[#allocation3 + $0xe0] sm:$0xff]  ;;  %v55_v32 = vld [vmem:[#allocation3 + $0xf0] sm:$0xff] }
  0x15   :  { %297 = vst [vmem:[#allocation2 + $0x10] sm:$0xf] %v249_v46  ;;  %v106_v4 = vand.u32 2147483647, %v46_v55  ;;  %v159_v5 = vadd.f32 %v102_v54, %v99_v39  ;;  %v107_v8 = vand.u32 2147483647, %v47_v57  ;;  %v160_v9 = vadd.f32 %v103_v56, %v100_v42 }
  0x16   :  { %298 = vst [vmem:[#allocation2 + $0x18] sm:$0xff] %v898_v47  ;;  %v108_v12 = vand.u32 2147483647, %v48_v62  ;;  %v109_v13 = vand.u32 2147483647, %v49_v63  ;;  %v161_v14 = vadd.f32 %v104_v58, %v101_v52  ;;  %v203_v15 = vadd.f32 %v155_v61, %v149_v59  ;;  %v56_v38 = vld [vmem:[#allocation3 + $0xf8] sm:$0xff] }
  0x17   :  { %v162_v16 = vadd.f32 %v105_v0, %v102_v54  ;;  %v204_v17 = vadd.f32 %v156_v1, %v150_v60  ;;  %v205_v18 = vadd.f32 %v157_v2, %v151_v27  ;;  %v206_v19 = vadd.f32 %v158_v3, %v152_v29  ;;  %v54_v24 = vld [vmem:[#allocation3 + $0xe8] sm:$0xf]  ;;  %v60_v57 = vld [vmem:[#allocation3 + $0x118] sm:$0xf]  ;;  %v61_v62 = vld [vmem:[#allocation3 + $0x120] sm:$0xff] }
  0x18   :  { %v110_v20 = vand.u32 2147483647, %v50_v6  ;;  %v111_v21 = vand.u32 2147483647, %v51_v7  ;;  %v163_v22 = vadd.f32 %v106_v4, %v103_v56  ;;  %v207_v23 = vadd.f32 %v159_v5, %v153_v31  ;;  %v57_v31 = vld [vmem:[#allocation3 + $0x100] sm:$0xf] }
  0x19   :  { %v112_v25 = vand.u32 2147483647, %v52_v10  ;;  %v903_v26 = vand.u32 2147483647, %v53_v11  ;;  %v164_v28 = vadd.f32 %v107_v8, %v104_v58  ;;  %v208_v30 = vadd.f32 %v160_v9, %v154_v34  ;;  %v58_v34 = vld [vmem:[#allocation3 + $0x108] sm:$0xff] }
  0x1a   :  { %v165_v33 = vadd.f32 %v108_v12, %v105_v0  ;;  %v905_v35 = vadd.f32 %v109_v13, %v106_v4  ;;  %v209_v36 = vadd.f32 %v161_v14, %v155_v61  ;;  %v907_v37 = vadd.f32 %v203_v15, %v101_v52  ;;  %v59_v52 = vld [vmem:[#allocation3 + $0x110] sm:$0xff] }
  0x1b   :  { %v210_v27 = vadd.f32 %v162_v16, %v156_v1  ;;  %v252_v29 = vadd.f32 %v204_v17, %v102_v54  ;;  %v909_v39 = vadd.f32 %v205_v18, %v103_v56  ;;  %v911_v40 = vadd.f32 %v206_v19, %v104_v58 }
  0x1c   :  { %v114_v41 = vand.u32 2147483647, %v54_v24  ;;  %v167_v42 = vadd.f32 %v110_v20, %v107_v8  ;;  %v211_v43 = vadd.f32 %v163_v22, %v157_v2  ;;  %v255_v46 = vadd.f32 %v207_v23, %v105_v0  ;;  %299 = vst [vmem:[#allocation2 + $0x20] sm:$0xff] %v907_v37 }
  0x1d   :  { %v115_v48 = vand.u32 2147483647, %v55_v32  ;;  %v168_v49 = vadd.f32 %v111_v21, %v108_v12  ;;  %v212_v50 = vadd.f32 %v164_v28, %v158_v3  ;;  %v914_v51 = vadd.f32 %v208_v30, %v106_v4  ;;  %300 = vst [vmem:[#allocation2 + $0x28] sm:$0xf] %v252_v29  ;;  %v62_v3 = vld [vmem:[#allocation3 + $0x128] sm:$0xff] }
  0x1e   :  { %v116_v53 = vand.u32 2147483647, %v56_v38  ;;  %v169_v54 = vadd.f32 %v112_v25, %v109_v13  ;;  %v213_v55 = vadd.f32 %v165_v33, %v159_v5  ;;  %v916_v56 = vadd.f32 %v209_v36, %v107_v8  ;;  %301 = vst [vmem:[#allocation2 + $0x30] sm:$0xff] %v909_v39  ;;  %v63_v8 = vld [vmem:[#allocation3 + $0x130] sm:$0xf] }
  0x1f   :  { %v117_v58 = vand.u32 2147483647, %v57_v31  ;;  %v170_v59 = vadd.f32 %v903_v26, %v110_v20  ;;  %v214_v60 = vadd.f32 %v905_v35, %v160_v9  ;;  %v258_v61 = vadd.f32 %v210_v27, %v108_v12  ;;  %302 = vst [vmem:[#allocation2 + $0x38] sm:$0xff] %v911_v40 }
  0x20   :  { %v118_v63 = vand.u32 2147483647, %v58_v34  ;;  %v171_v0 = vadd.f32 %v114_v41, %v111_v21  ;;  %v215_v1 = vadd.f32 %v167_v42, %v161_v14  ;;  %v922_v2 = vadd.f32 %v211_v43, %v109_v13  ;;  %303 = vst [vmem:[#allocation2 + $0x40] sm:$0xf] %v255_v46  ;;  %v64_v14 = vld [vmem:[#allocation3 + $0x138] sm:$0xff] }
  0x21   :  { %v119_v4 = vand.u32 2147483647, %v59_v52  ;;  %v172_v5 = vadd.f32 %v115_v48, %v112_v25  ;;  %v216_v6 = vadd.f32 %v168_v49, %v162_v16  ;;  %v924_v7 = vadd.f32 %v212_v50, %v110_v20  ;;  %304 = vst [vmem:[#allocation2 + $0x48] sm:$0xff] %v914_v51  ;;  %v65_v16 = vld [vmem:[#allocation3 + $0x140] sm:$0xff] }
  0x22   :  { %v120_v9 = vand.u32 2147483647, %v60_v57  ;;  %v173_v10 = vadd.f32 %v116_v53, %v903_v26  ;;  %v217_v11 = vadd.f32 %v169_v54, %v163_v22  ;;  %v261_v12 = vadd.f32 %v213_v55, %v111_v21  ;;  %305 = vst [vmem:[#allocation2 + $0x50] sm:$0xff] %v916_v56  ;;  %v66_v22 = vld [vmem:[#allocation3 + $0x148] sm:$0xf] }
  0x23   :  { %v121_v13 = vand.u32 2147483647, %v61_v62  ;;  %v174_v15 = vadd.f32 %v117_v58, %v114_v41  ;;  %v218_v17 = vadd.f32 %v170_v59, %v164_v28  ;;  %v929_v18 = vadd.f32 %v214_v60, %v112_v25  ;;  %306 = vst [vmem:[#allocation2 + $0x58] sm:$0xf] %v258_v61  ;;  %v67_v25 = vld [vmem:[#allocation3 + $0x150] sm:$0xff]  ;;  %v70_v55 = vld [vmem:[#allocation3 + $0x168] sm:$0xff] }
  0x24   :  { %v122_v19 = vand.u32 2147483647, %v62_v3  ;;  %v175_v20 = vadd.f32 %v118_v63, %v115_v48  ;;  %v219_v23 = vadd.f32 %v171_v0, %v165_v33  ;;  %v932_v24 = vadd.f32 %v215_v1, %v903_v26  ;;  %307 = vst [vmem:[#allocation2 + $0x60] sm:$0xff] %v922_v2  ;;  %v68_v33 = vld [vmem:[#allocation3 + $0x158] sm:$0xff]  ;;  %v69_v34 = vld [vmem:[#allocation3 + $0x160] sm:$0xf] }
  0x25   :  { %v123_v21 = vand.u32 2147483647, %v63_v8  ;;  %v176_v30 = vadd.f32 %v119_v4, %v116_v53  ;;  %v220_v32 = vadd.f32 %v172_v5, %v905_v35  ;;  %v264_v36 = vadd.f32 %v216_v6, %v114_v41  ;;  %308 = vst [vmem:[#allocation2 + $0x68] sm:$0xff] %v924_v7  ;;  %v71_v61 = vld [vmem:[#allocation3 + $0x170] sm:$0xff]  ;;  %v72_v3 = vld [vmem:[#allocation3 + $0x178] sm:$0xf] }
  0x26   :  { %v124_v28 = vand.u32 2147483647, %v64_v14  ;;  %v177_v38 = vadd.f32 %v120_v9, %v117_v58  ;;  %v221_v27 = vadd.f32 %v173_v10, %v167_v42  ;;  %v937_v29 = vadd.f32 %v217_v11, %v115_v48  ;;  %309 = vst [vmem:[#allocation2 + $0x70] sm:$0xf] %v261_v12  ;;  %v73_v11 = vld [vmem:[#allocation3 + $0x180] sm:$0xff] }
  0x27   :  { %v125_v26 = vand.u32 2147483647, %v65_v16  ;;  %v178_v31 = vadd.f32 %v121_v13, %v118_v63  ;;  %v222_v43 = vadd.f32 %v174_v15, %v168_v49  ;;  %v939_v46 = vadd.f32 %v218_v17, %v116_v53  ;;  %310 = vst [vmem:[#allocation2 + $0x78] sm:$0xff] %v929_v18  ;;  %v74_v17 = vld [vmem:[#allocation3 + $0x188] sm:$0xff] }
  0x28   :  { %v126_v35 = vand.u32 2147483647, %v66_v22  ;;  %v179_v41 = vadd.f32 %v122_v19, %v119_v4  ;;  %v223_v50 = vadd.f32 %v175_v20, %v169_v54  ;;  %v267_v52 = vadd.f32 %v219_v23, %v117_v58  ;;  %311 = vst [vmem:[#allocation2 + $0x80] sm:$0xff] %v932_v24  ;;  %v75_v22 = vld [vmem:[#allocation3 + $0x190] sm:$0xf] }
  0x29   :  { %v127_v42 = vand.u32 2147483647, %v67_v25  ;;  %v180_v48 = vadd.f32 %v123_v21, %v120_v9  ;;  %v224_v57 = vadd.f32 %v176_v30, %v170_v59  ;;  %v943_v60 = vadd.f32 %v220_v32, %v118_v63  ;;  %312 = vst [vmem:[#allocation2 + $0x88] sm:$0xf] %v264_v36  ;;  %v76_v25 = vld [vmem:[#allocation3 + $0x198] sm:$0xff] }
  0x2a   :  { %v128_v49 = vand.u32 2147483647, %v68_v33  ;;  %v181_v53 = vadd.f32 %v124_v28, %v121_v13  ;;  %v225_v62 = vadd.f32 %v177_v38, %v171_v0  ;;  %v945_v1 = vadd.f32 %v221_v27, %v119_v4  ;;  %313 = vst [vmem:[#allocation2 + $0x90] sm:$0xff] %v937_v29 }
  0x2b   :  { %v129_v54 = vand.u32 2147483647, %v69_v34  ;;  %v182_v58 = vadd.f32 %v125_v26, %v122_v19  ;;  %v226_v6 = vadd.f32 %v178_v31, %v172_v5  ;;  %v270_v8 = vadd.f32 %v222_v43, %v120_v9  ;;  %314 = vst [vmem:[#allocation2 + $0x98] sm:$0xff] %v939_v46  ;;  %v77_v43 = vld [vmem:[#allocation3 + $0x1a0] sm:$0xff] }
  0x2c   :  { %v130_v59 = vand.u32 2147483647, %v70_v55  ;;  %v183_v63 = vadd.f32 %v126_v35, %v123_v21  ;;  %v227_v12 = vadd.f32 %v179_v41, %v173_v10  ;;  %v949_v14 = vadd.f32 %v223_v50, %v121_v13  ;;  %315 = vst [vmem:[#allocation2 + $0xa0] sm:$0xf] %v267_v52  ;;  %v78_v52 = vld [vmem:[#allocation3 + $0x1a8] sm:$0xf] }
  0x2d   :  { %v131_v0 = vand.u32 2147483647, %v71_v61  ;;  %v184_v4 = vadd.f32 %v127_v42, %v124_v28  ;;  %v228_v16 = vadd.f32 %v180_v48, %v174_v15  ;;  %v951_v23 = vadd.f32 %v224_v57, %v122_v19  ;;  %316 = vst [vmem:[#allocation2 + $0xa8] sm:$0xff] %v943_v60  ;;  %v79_v61 = vld [vmem:[#allocation3 + $0x1b0] sm:$0xff] }
  0x2e   :  { %v132_v5 = vand.u32 2147483647, %v72_v3  ;;  %v185_v9 = vadd.f32 %v128_v49, %v125_v26  ;;  %v229_v32 = vadd.f32 %v181_v53, %v175_v20  ;;  %v273_v36 = vadd.f32 %v225_v62, %v123_v21  ;;  %317 = vst [vmem:[#allocation2 + $0xb0] sm:$0xff] %v945_v1 }
  0x2f   :  { %v133_v10 = vand.u32 2147483647, %v73_v11  ;;  %v186_v13 = vadd.f32 %v129_v54, %v126_v35  ;;  %v230_v27 = vadd.f32 %v182_v58, %v176_v30  ;;  %v955_v33 = vadd.f32 %v226_v6, %v124_v28  ;;  %318 = vst [vmem:[#allocation2 + $0xb8] sm:$0xf] %v270_v8  ;;  %v80_v6 = vld [vmem:[#allocation3 + $0x1b8] sm:$0xff] }
  0x30   :  { %v134_v15 = vand.u32 2147483647, %v74_v17  ;;  %v187_v19 = vadd.f32 %v130_v59, %v127_v42  ;;  %v231_v34 = vadd.f32 %v183_v63, %v177_v38  ;;  %v957_v50 = vadd.f32 %v227_v12, %v125_v26  ;;  %319 = vst [vmem:[#allocation2 + $0xc0] sm:$0xff] %v949_v14  ;;  %v81_v12 = vld [vmem:[#allocation3 + $0x1c0] sm:$0xf] }
  0x31   :  { %v135_v20 = vand.u32 2147483647, %v75_v22  ;;  %v188_v21 = vadd.f32 %v131_v0, %v128_v49  ;;  %v232_v55 = vadd.f32 %v184_v4, %v178_v31  ;;  %v276_v57 = vadd.f32 %v228_v16, %v126_v35  ;;  %320 = vst [vmem:[#allocation2 + $0xc8] sm:$0xff] %v951_v23 }
  0x32   :  { %v136_v30 = vand.u32 2147483647, %v76_v25  ;;  %v189_v28 = vadd.f32 %v132_v5, %v129_v54  ;;  %v233_v62 = vadd.f32 %v185_v9, %v179_v41  ;;  %v961_v3 = vadd.f32 %v229_v32, %v127_v42  ;;  %321 = vst [vmem:[#allocation2 + $0xd0] sm:$0xf] %v273_v36 }
  0x33   :  { %v137_v38 = vand.u32 2147483647, %v77_v43  ;;  %v190_v26 = vadd.f32 %v133_v10, %v130_v59  ;;  %v234_v8 = vadd.f32 %v186_v13, %v180_v48  ;;  %v963_v11 = vadd.f32 %v230_v27, %v128_v49  ;;  %322 = vst [vmem:[#allocation2 + $0xd8] sm:$0xff] %v955_v33 }
  0x34   :  { %v138_v31 = vand.u32 2147483647, %v78_v52  ;;  %v191_v35 = vadd.f32 %v134_v15, %v131_v0  ;;  %v235_v17 = vadd.f32 %v187_v19, %v181_v53  ;;  %v279_v16 = vadd.f32 %v231_v34, %v129_v54  ;;  %323 = vst [vmem:[#allocation2 + $0xe0] sm:$0xff] %v957_v50 }
  0x35   :  { %v139_v22 = vand.u32 2147483647, %v79_v61  ;;  %v192_v41 = vadd.f32 %v135_v20, %v132_v5  ;;  %v236_v42 = vadd.f32 %v188_v21, %v182_v58  ;;  %v967_v32 = vadd.f32 %v232_v55, %v130_v59  ;;  %324 = vst [vmem:[#allocation2 + $0xe8] sm:$0xf] %v276_v57 }
  0x36   :  { %v140_v36 = vand.u32 2147483647, %v80_v6  ;;  %v193_v25 = vadd.f32 %v136_v30, %v133_v10  ;;  %v237_v48 = vadd.f32 %v189_v28, %v183_v63  ;;  %v969_v49 = vadd.f32 %v233_v62, %v131_v0  ;;  %325 = vst [vmem:[#allocation2 + $0xf0] sm:$0xff] %v961_v3  ;;  %v82_v63 = vld [vmem:[#allocation3 + $0x1c8] sm:$0xff] }
  0x37   :  { %v141_v27 = vand.u32 2147483647, %v81_v12  ;;  %v194_v43 = vadd.f32 %v137_v38, %v134_v15  ;;  %v238_v52 = vadd.f32 %v190_v26, %v184_v4  ;;  %v282_v53 = vadd.f32 %v234_v8, %v132_v5  ;;  %326 = vst [vmem:[#allocation2 + $0xf8] sm:$0xff] %v963_v11  ;;  %v83_v4 = vld [vmem:[#allocation3 + $0x1d0] sm:$0xff] }
  0x38   :  { %v195_v54 = vadd.f32 %v138_v31, %v135_v20  ;;  %v239_v34 = vadd.f32 %v191_v35, %v185_v9  ;;  %v973_v61 = vadd.f32 %v235_v17, %v133_v10  ;;  %327 = vst [vmem:[#allocation2 + $0x100] sm:$0xf] %v279_v16  ;;  %v196_v58 = vadd.f32 %v139_v22, %v136_v30  ;;  %v84_v9 = vld [vmem:[#allocation3 + $0x1d8] sm:$0xf] }
  0x39   :  { %v240_v59 = vadd.f32 %v192_v41, %v186_v13  ;;  %v975_v55 = vadd.f32 %v236_v42, %v134_v15  ;;  %328 = vst [vmem:[#allocation2 + $0x108] sm:$0xff] %v967_v32  ;;  %v197_v0 = vadd.f32 %v140_v36, %v137_v38  ;;  %v241_v57 = vadd.f32 %v193_v25, %v187_v19 }
  0x3a   :  { %v285_v62 = vadd.f32 %v237_v48, %v135_v20  ;;  %329 = vst [vmem:[#allocation2 + $0x110] sm:$0xff] %v969_v49  ;;  %v198_v5 = vadd.f32 %v141_v27, %v138_v31  ;;  %v242_v6 = vadd.f32 %v194_v43, %v188_v21  ;;  %v979_v8 = vadd.f32 %v238_v52, %v136_v30  ;;  %v378_v48 = vld [vmem:[#allocation2 + $0x21] sm:$0xff]  ;;  %v440_v43 = vld [vmem:[#allocation2 + $0xa] sm:$0xff] }
  0x3b   :  { %330 = vst [vmem:[#allocation2 + $0x118] sm:$0xf] %v282_v53  ;;  %v243_v10 = vadd.f32 %v195_v54, %v189_v28  ;;  %v981_v12 = vadd.f32 %v239_v34, %v137_v38  ;;  %v142_v13 = vand.u32 2147483647, %v82_v63  ;;  %v244_v15 = vadd.f32 %v196_v58, %v190_v26  ;;  %v379_v53 = vld [vmem:[#allocation2 + $0x31] sm:$0xff]  ;;  %v441_v54 = vld [vmem:[#allocation2 + $0x1a] sm:$0xff] }
  0x3c   :  { %331 = vst [vmem:[#allocation2 + $0x120] sm:$0xff] %v973_v61  ;;  %v288_v17 = vadd.f32 %v240_v59, %v138_v31  ;;  %v143_v19 = vand.u32 2147483647, %v83_v4  ;;  %v245_v20 = vadd.f32 %v197_v0, %v191_v35  ;;  %v985_v16 = vadd.f32 %v241_v57, %v139_v22  ;;  %v375_v35 = vld [vmem:[#allocation2 + $0x1] sm:$0xff]  ;;  %v376_v22 = vld [vmem:[#allocation2 + $0x9] sm:$0xff]  ;;  %v380_v34 = vld [vmem:[#allocation2 + $0x39] sm:$0xff] }
  0x3d   :  { %332 = vst [vmem:[#allocation2 + $0x128] sm:$0xff] %v975_v55  ;;  %v144_v21 = vand.u32 2147483647, %v84_v9  ;;  %v246_v30 = vadd.f32 %v198_v5, %v192_v41  ;;  %v987_v42 = vadd.f32 %v242_v6, %v140_v36  ;;  %v291_v28 = vadd.f32 %v243_v10, %v141_v27  ;;  %v377_v41 = vld [vmem:[#allocation2 + $0x19] sm:$0xff]  ;;  %v439_v27 = vld [vmem:[#allocation2 + $0x2] sm:$0xff]  ;;  %v382_v10 = vld [vmem:[#allocation2 + $0x51] sm:$0xff] }
  0x3e   :  { %333 = vst [vmem:[#allocation2 + $0x130] sm:$0xf] %v285_v62  ;;  %v991_v38 = vadd.f32 %v244_v15, %v142_v13  ;;  %v993_v26 = vadd.f32 %v245_v20, %v143_v19  ;;  %v407_v36 = vadd.f32 %v375_v35, %v894_v44  ;;  %v408_v25 = vadd.f32 %v376_v22, %v896_v45  ;;  %v442_v0 = vld [vmem:[#allocation2 + $0x22] sm:$0xff]  ;;  %v504_v62 = vld [vmem:[#allocation2 + $0xb] sm:$0xff]  ;;  %v444_v13 = vld [vmem:[#allocation2 + $0x3a] sm:$0xff] }
  0x3f   :  { %334 = vst [vmem:[#allocation2 + $0x138] sm:$0xff] %v979_v8  ;;  %v294_v31 = vadd.f32 %v246_v30, %v144_v21  ;;  %v409_v52 = vadd.f32 %v377_v41, %v898_v47  ;;  %v410_v58 = vadd.f32 %v378_v48, %v907_v37  ;;  %v503_v57 = vld [vmem:[#allocation2 + $0x3] sm:$0xff]  ;;  %v411_v4 = vadd.f32 %v379_v53, %v909_v39  ;;  %v1004_v5 = vld [vmem:[#allocation3 + $0x32] sm:$0xff]  ;;  %v505_v47 = vld [vmem:[#allocation2 + $0x1b] sm:$0xff] }
  0x40   :  { %335 = vst [vmem:[#allocation2 + $0x140] sm:$0xff] %v981_v12  ;;  %v471_v59 = vadd.f32 %v439_v27, %v407_v36  ;;  %v472_v63 = vadd.f32 %v440_v43, %v408_v25  ;;  %v381_v45 = vld [vmem:[#allocation2 + $0x49] sm:$0xff]  ;;  %v412_v6 = vadd.f32 %v380_v34, %v911_v40  ;;  %v443_v9 = vld [vmem:[#allocation2 + $0x32] sm:$0xff]  ;;  %v1007_v19 = vld [vmem:[#allocation3 + $0x3a] sm:$0xff]  ;;  %v414_v40 = vadd.f32 %v382_v10, %v916_v56 }
  0x41   :  { %336 = vst [vmem:[#allocation2 + $0x148] sm:$0xf] %v288_v17  ;;  %v473_v44 = vadd.f32 %v441_v54, %v409_v52  ;;  %v474_v15 = vadd.f32 %v442_v0, %v410_v58  ;;  %v506_v20 = vld [vmem:[#allocation2 + $0x23] sm:$0xff]  ;;  %v568_v30 = vld [vmem:[#allocation2 + $0xc] sm:$0xff]  ;;  %v413_v39 = vadd.f32 %v381_v45, %v914_v51  ;;  %v664_v27 = vand.u32 2147483647, %v1004_v5 }
  0x42   :  { %337 = vst [vmem:[#allocation2 + $0x150] sm:$0xff] %v985_v16  ;;  %v535_v17 = vadd.f32 %v503_v57, %v471_v59  ;;  %v536_v37 = vadd.f32 %v504_v62, %v472_v63  ;;  %v567_v21 = vld [vmem:[#allocation2 + $0x4] sm:$0xff]  ;;  %v476_v36 = vadd.f32 %v444_v13, %v412_v6  ;;  %v507_v25 = vld [vmem:[#allocation2 + $0x33] sm:$0xff]  ;;  %v569_v48 = vld [vmem:[#allocation2 + $0x1c] sm:$0xff]  ;;  %v665_v51 = vand.u32 2147483647, %v1007_v19 }
  0x43   :  { %338 = vst [vmem:[#allocation2 + $0x158] sm:$0xff] %v987_v42  ;;  %v537_v35 = vadd.f32 %v505_v47, %v473_v44  ;;  %v1010_v22 = vld [vmem:[#allocation3 + $0x4a] sm:$0xff]  ;;  %v446_v52 = vld [vmem:[#allocation2 + $0x52] sm:$0xff]  ;;  %v508_v53 = vld [vmem:[#allocation2 + $0x3b] sm:$0xff]  ;;  %v538_v54 = vadd.f32 %v506_v20, %v474_v15 }
  0x44   :  { %339 = vst [vmem:[#allocation2 + $0x160] sm:$0xf] %v291_v28  ;;  %v383_v28 = vld [vmem:[#allocation2 + $0x61] sm:$0xff]  ;;  %v445_v41 = vld [vmem:[#allocation2 + $0x4a] sm:$0xff]  ;;  %v599_v34 = vadd.f32 %v567_v21, %v535_v17  ;;  %v600_v58 = vadd.f32 %v568_v30, %v536_v37  ;;  %v1016_v0 = vld [vmem:[#allocation3 + $0x52] sm:$0xff]  ;;  %v540_v10 = vadd.f32 %v508_v53, %v476_v36 }
  0x45   :  { %340 = vst [vmem:[#allocation2 + $0x168] sm:$0xff] %v991_v38  ;;  %v384_v43 = vld [vmem:[#allocation2 + $0x69] sm:$0xff]  ;;  %v415_v59 = vadd.f32 %v383_v28, %v922_v2  ;;  %v385_v56 = vld [vmem:[#allocation2 + $0x79] sm:$0xff]  ;;  %v477_v62 = vadd.f32 %v445_v41, %v413_v39  ;;  %v601_v44 = vadd.f32 %v569_v48, %v537_v35  ;;  %v666_v5 = vand.u32 2147483647, %v1010_v22  ;;  %v386_v2 = vld [vmem:[#allocation2 + $0x81] sm:$0xff] }
  0x46   :  { %341 = vst [vmem:[#allocation2 + $0x170] sm:$0xff] %v993_v26  ;;  %v570_v63 = vld [vmem:[#allocation2 + $0x24] sm:$0xff]  ;;  %v416_v6 = vadd.f32 %v384_v43, %v924_v7  ;;  %v571_v13 = vld [vmem:[#allocation2 + $0x34] sm:$0xff]  ;;  %v572_v15 = vld [vmem:[#allocation2 + $0x3c] sm:$0xff]  ;;  %v667_v20 = vand.u32 2147483647, %v1016_v0  ;;  %v696_v21 = vsub.f32 %v599_v34, %v664_v27  ;;  %v697_v30 = vsub.f32 %v600_v58, %v665_v51 }
  0x47   :  { %342 = vst [vmem:[#allocation2 + $0x178] sm:$0xf] %v294_v31  ;;  %v475_v31 = vadd.f32 %v443_v9, %v411_v4  ;;  %v447_v57 = vld [vmem:[#allocation2 + $0x62] sm:$0xff]  ;;  %v478_v9 = vadd.f32 %v446_v52, %v414_v40  ;;  %v509_v47 = vld [vmem:[#allocation2 + $0x4b] sm:$0xff]  ;;  %v510_v37 = vld [vmem:[#allocation2 + $0x53] sm:$0xff]  ;;  %v602_v19 = vadd.f32 %v570_v63, %v538_v54  ;;  %v417_v28 = vadd.f32 %v385_v56, %v929_v18 }
  0x48   :  { %v1018_v45 = vld [vmem:[#allocation3 + $0x62] sm:$0xff]  ;;  %v448_v17 = vld [vmem:[#allocation2 + $0x6a] sm:$0xff]  ;;  %v479_v39 = vadd.f32 %v447_v57, %v415_v59  ;;  %v449_v7 = vld [vmem:[#allocation2 + $0x7a] sm:$0xff]  ;;  %v541_v40 = vadd.f32 %v509_v47, %v477_v62  ;;  %v418_v48 = vadd.f32 %v386_v2, %v932_v24  ;;  %v604_v34 = vadd.f32 %v572_v15, %v540_v10 }
  0x49   :  { %v539_v4 = vadd.f32 %v507_v25, %v475_v31  ;;  %v1024_v31 = vld [vmem:[#allocation3 + $0x6a] sm:$0xff]  ;;  %v668_v36 = vand.u32 2147483647, %v1018_v45  ;;  %v698_v25 = vsub.f32 %v601_v44, %v666_v5  ;;  %v480_v43 = vadd.f32 %v448_v17, %v416_v6  ;;  %v574_v54 = vld [vmem:[#allocation2 + $0x54] sm:$0xff]  ;;  %v450_v59 = vld [vmem:[#allocation2 + $0x82] sm:$0xff] }
  0x4a   :  { %v387_v35 = vld [vmem:[#allocation2 + $0x91] sm:$0xff]  ;;  %v511_v22 = vld [vmem:[#allocation2 + $0x63] sm:$0xff]  ;;  %v542_v52 = vadd.f32 %v510_v37, %v478_v9  ;;  %v1028_v58 = vld [vmem:[#allocation3 + $0x7a] sm:$0xff]  ;;  %v669_v0 = vand.u32 2147483647, %v1024_v31  ;;  %v699_v56 = vsub.f32 %v602_v19, %v667_v20  ;;  %v728_v57 = vmul.f32 %v696_v21, %v664_v27 }
  0x4b   :  { %v603_v41 = vadd.f32 %v571_v13, %v539_v4  ;;  %v573_v53 = vld [vmem:[#allocation2 + $0x4c] sm:$0xff]  ;;  %v388_v18 = vld [vmem:[#allocation2 + $0x99] sm:$0xff]  ;;  %v729_v62 = vmul.f32 %v697_v30, %v665_v51  ;;  %v419_v4 = vadd.f32 %v387_v35, %v937_v29  ;;  %v481_v44 = vadd.f32 %v449_v7, %v417_v28  ;;  %v575_v24 = vld [vmem:[#allocation2 + $0x64] sm:$0xff] }
  0x4c   :  { %v512_v63 = vld [vmem:[#allocation2 + $0x6b] sm:$0xff]  ;;  %v543_v45 = vadd.f32 %v511_v22, %v479_v39  ;;  %v1032_v6 = vld [vmem:[#allocation3 + $0x82] sm:$0xff]  ;;  %v605_v13 = vadd.f32 %v573_v53, %v541_v40  ;;  %v670_v15 = vand.u32 2147483647, %v1028_v58  ;;  %v730_v17 = vmul.f32 %v698_v25, %v666_v5  ;;  %v452_v28 = vld [vmem:[#allocation2 + $0x9a] sm:$0xff] }
  0x4d   :  { %v389_v9 = vld [vmem:[#allocation2 + $0xa9] sm:$0xff]  ;;  %v451_v47 = vld [vmem:[#allocation2 + $0x92] sm:$0xff]  ;;  %v513_v10 = vld [vmem:[#allocation2 + $0x7b] sm:$0xff]  ;;  %v700_v2 = vsub.f32 %v603_v41, %v668_v36  ;;  %v420_v37 = vadd.f32 %v388_v18, %v939_v46  ;;  %v482_v19 = vadd.f32 %v450_v59, %v418_v48  ;;  %v544_v27 = vadd.f32 %v512_v63, %v480_v43 }
  0x4e   :  { %v576_v51 = vld [vmem:[#allocation2 + $0x6c] sm:$0xff]  ;;  %v606_v21 = vadd.f32 %v574_v54, %v542_v52  ;;  %v514_v39 = vld [vmem:[#allocation2 + $0x83] sm:$0xff]  ;;  %v671_v31 = vand.u32 2147483647, %v1032_v6  ;;  %v701_v35 = vsub.f32 %v604_v34, %v669_v0  ;;  %v731_v7 = vmul.f32 %v699_v56, %v667_v20  ;;  %v1040_v48 = vld [vmem:[#allocation3 + $0x9a] sm:$0xff] }
  0x4f   :  { %v1036_v29 = vld [vmem:[#allocation3 + $0x92] sm:$0xff]  ;;  %v760_v22 = vadd.f32 %v729_v62, %v728_v57  ;;  %v421_v40 = vadd.f32 %v389_v9, %v943_v60  ;;  %v483_v41 = vadd.f32 %v451_v47, %v419_v4  ;;  %v545_v5 = vadd.f32 %v513_v10, %v481_v44  ;;  %v577_v25 = vld [vmem:[#allocation2 + $0x7c] sm:$0xff]  ;;  %v453_v52 = vld [vmem:[#allocation2 + $0xaa] sm:$0xff] }
  0x50   :  { %v390_v30 = vld [vmem:[#allocation2 + $0xb1] sm:$0xff]  ;;  %v607_v46 = vadd.f32 %v575_v24, %v543_v45  ;;  %v391_v43 = vld [vmem:[#allocation2 + $0xc1] sm:$0xff]  ;;  %v672_v54 = vand.u32 2147483647, %v1036_v29  ;;  %v702_v58 = vsub.f32 %v605_v13, %v670_v15  ;;  %v732_v18 = vmul.f32 %v700_v2, %v668_v36  ;;  %v392_v62 = vld [vmem:[#allocation2 + $0xc9] sm:$0xff] }
  0x51   :  { %v515_v53 = vld [vmem:[#allocation2 + $0x93] sm:$0xff]  ;;  %v761_v59 = vadd.f32 %v760_v22, %v730_v17  ;;  %v422_v34 = vadd.f32 %v390_v30, %v945_v1  ;;  %v484_v20 = vadd.f32 %v452_v28, %v420_v37  ;;  %v546_v63 = vadd.f32 %v514_v39, %v482_v19  ;;  %v578_v56 = vld [vmem:[#allocation2 + $0x84] sm:$0xff]  ;;  %v516_v44 = vld [vmem:[#allocation2 + $0x9b] sm:$0xff] }
  0x52   :  { %v608_v60 = vadd.f32 %v576_v51, %v544_v27  ;;  %v1044_v57 = vld [vmem:[#allocation3 + $0xaa] sm:$0xff]  ;;  %v454_v4 = vld [vmem:[#allocation2 + $0xb2] sm:$0xff]  ;;  %v673_v45 = vand.u32 2147483647, %v1040_v48  ;;  %v703_v24 = vsub.f32 %v606_v21, %v671_v31  ;;  %v733_v6 = vmul.f32 %v701_v35, %v669_v0  ;;  %v455_v37 = vld [vmem:[#allocation2 + $0xc2] sm:$0xff] }
  0x53   :  { %v762_v9 = vadd.f32 %v761_v59, %v731_v7  ;;  %v423_v47 = vadd.f32 %v391_v43, %v949_v14  ;;  %v485_v36 = vadd.f32 %v453_v52, %v421_v40  ;;  %v547_v10 = vadd.f32 %v515_v53, %v483_v41  ;;  %v579_v13 = vld [vmem:[#allocation2 + $0x94] sm:$0xff]  ;;  %v517_v19 = vld [vmem:[#allocation2 + $0xab] sm:$0xff]  ;;  %v580_v39 = vld [vmem:[#allocation2 + $0x9c] sm:$0xff] }
  0x54   :  { %v609_v1 = vadd.f32 %v577_v25, %v545_v5  ;;  %v1048_v2 = vld [vmem:[#allocation3 + $0xb2] sm:$0xff]  ;;  %v674_v27 = vand.u32 2147483647, %v1044_v57  ;;  %v704_v51 = vsub.f32 %v607_v46, %v672_v54  ;;  %v734_v29 = vmul.f32 %v702_v58, %v670_v15  ;;  %v1052_v35 = vld [vmem:[#allocation3 + $0xc2] sm:$0xff]  ;;  %v456_v22 = vld [vmem:[#allocation2 + $0xca] sm:$0xff] }
  0x55   :  { %v393_v17 = vld [vmem:[#allocation2 + $0xd9] sm:$0xff]  ;;  %v763_v30 = vadd.f32 %v762_v9, %v732_v18  ;;  %v424_v21 = vadd.f32 %v392_v62, %v951_v23  ;;  %v486_v0 = vadd.f32 %v454_v4, %v422_v34  ;;  %v548_v28 = vadd.f32 %v516_v44, %v484_v20  ;;  %v394_v7 = vld [vmem:[#allocation2 + $0xe1] sm:$0xff]  ;;  %v581_v52 = vld [vmem:[#allocation2 + $0xac] sm:$0xff] }
  0x56   :  { %v610_v14 = vadd.f32 %v578_v56, %v546_v63  ;;  %v518_v40 = vld [vmem:[#allocation2 + $0xb3] sm:$0xff]  ;;  %v675_v41 = vand.u32 2147483647, %v1048_v2  ;;  %v705_v5 = vsub.f32 %v608_v60, %v673_v45  ;;  %v735_v25 = vmul.f32 %v703_v24, %v671_v31  ;;  %v1056_v53 = vld [vmem:[#allocation3 + $0xca] sm:$0xff]  ;;  %v458_v24 = vld [vmem:[#allocation2 + $0xe2] sm:$0xff] }
  0x57   :  { %v764_v48 = vadd.f32 %v763_v30, %v733_v6  ;;  %v425_v46 = vadd.f32 %v393_v17, %v955_v33  ;;  %v487_v15 = vadd.f32 %v455_v37, %v423_v47  ;;  %v549_v43 = vadd.f32 %v517_v19, %v485_v36  ;;  %v395_v58 = vld [vmem:[#allocation2 + $0xf1] sm:$0xff]  ;;  %v457_v18 = vld [vmem:[#allocation2 + $0xda] sm:$0xff]  ;;  %v519_v59 = vld [vmem:[#allocation2 + $0xc3] sm:$0xff] }
  0x58   :  { %v611_v23 = vadd.f32 %v579_v13, %v547_v10  ;;  %v676_v34 = vand.u32 2147483647, %v1052_v35  ;;  %v706_v20 = vsub.f32 %v609_v1, %v674_v27  ;;  %v736_v63 = vmul.f32 %v704_v51, %v672_v54  ;;  %v582_v62 = vld [vmem:[#allocation2 + $0xb4] sm:$0xff]  ;;  %v520_v6 = vld [vmem:[#allocation2 + $0xcb] sm:$0xff]  ;;  %v1064_v17 = vld [vmem:[#allocation3 + $0xe2] sm:$0xff] }
  0x59   :  { %v765_v56 = vadd.f32 %v764_v48, %v734_v29  ;;  %v426_v60 = vadd.f32 %v394_v7, %v957_v50  ;;  %v488_v31 = vadd.f32 %v456_v22, %v424_v21  ;;  %v550_v57 = vadd.f32 %v518_v40, %v486_v0  ;;  %v1060_v4 = vld [vmem:[#allocation3 + $0xda] sm:$0xff]  ;;  %v583_v2 = vld [vmem:[#allocation2 + $0xc4] sm:$0xff]  ;;  %v459_v19 = vld [vmem:[#allocation2 + $0xf2] sm:$0xff] }
  0x5a   :  { %v612_v33 = vadd.f32 %v580_v39, %v548_v28  ;;  %v396_v44 = vld [vmem:[#allocation2 + $0xf9] sm:$0xff]  ;;  %v677_v9 = vand.u32 2147483647, %v1056_v53  ;;  %v707_v47 = vsub.f32 %v610_v14, %v675_v41  ;;  %v737_v36 = vmul.f32 %v705_v5, %v673_v45  ;;  %v397_v37 = vld [vmem:[#allocation2 + $0x109] sm:$0xff]  ;;  %v398_v7 = vld [vmem:[#allocation2 + $0x111] sm:$0xff] }
  0x5b   :  { %v766_v10 = vadd.f32 %v765_v56, %v735_v25  ;;  %v427_v13 = vadd.f32 %v395_v58, %v961_v3  ;;  %v489_v54 = vadd.f32 %v457_v18, %v425_v46  ;;  %v551_v1 = vadd.f32 %v519_v59, %v487_v15  ;;  %v521_v51 = vld [vmem:[#allocation2 + $0xdb] sm:$0xff]  ;;  %v584_v14 = vld [vmem:[#allocation2 + $0xcc] sm:$0xff]  ;;  %v522_v40 = vld [vmem:[#allocation2 + $0xe3] sm:$0xff] }
  0x5c   :  { %v613_v50 = vadd.f32 %v581_v52, %v549_v43  ;;  %v678_v29 = vand.u32 2147483647, %v1060_v4  ;;  %v708_v30 = vsub.f32 %v611_v23, %v676_v34  ;;  %v738_v21 = vmul.f32 %v706_v20, %v674_v27  ;;  %v1068_v35 = vld [vmem:[#allocation3 + $0xf2] sm:$0xff]  ;;  %v460_v22 = vld [vmem:[#allocation2 + $0xfa] sm:$0xff]  ;;  %v461_v58 = vld [vmem:[#allocation2 + $0x10a] sm:$0xff] }
  0x5d   :  { %v767_v0 = vadd.f32 %v766_v10, %v736_v63  ;;  %v428_v28 = vadd.f32 %v396_v44, %v963_v11  ;;  %v490_v45 = vadd.f32 %v458_v24, %v426_v60  ;;  %v552_v39 = vadd.f32 %v520_v6, %v488_v31  ;;  %v585_v52 = vld [vmem:[#allocation2 + $0xdc] sm:$0xff]  ;;  %v523_v18 = vld [vmem:[#allocation2 + $0xf3] sm:$0xff] }
  0x5e   :  { %v614_v3 = vadd.f32 %v582_v62, %v550_v57  ;;  %v679_v5 = vand.u32 2147483647, %v1064_v17  ;;  %v709_v25 = vsub.f32 %v612_v33, %v677_v9  ;;  %v739_v48 = vmul.f32 %v707_v47, %v675_v41  ;;  %v1072_v23 = vld [vmem:[#allocation3 + $0xfa] sm:$0xff]  ;;  %v586_v57 = vld [vmem:[#allocation2 + $0xe4] sm:$0xff]  ;;  %v462_v4 = vld [vmem:[#allocation2 + $0x112] sm:$0xff] }
  0x5f   :  { %v768_v46 = vadd.f32 %v767_v0, %v737_v36  ;;  %v429_v15 = vadd.f32 %v397_v37, %v967_v32  ;;  %v491_v27 = vadd.f32 %v459_v19, %v427_v13  ;;  %v553_v43 = vadd.f32 %v521_v51, %v489_v54  ;;  %v399_v53 = vld [vmem:[#allocation2 + $0x121] sm:$0xff]  ;;  %v1076_v62 = vld [vmem:[#allocation3 + $0x10a] sm:$0xff]  ;;  %v587_v54 = vld [vmem:[#allocation2 + $0xf4] sm:$0xff] }
  0x60   :  { %v615_v11 = vadd.f32 %v583_v2, %v551_v1  ;;  %v680_v59 = vand.u32 2147483647, %v1068_v35  ;;  %v710_v20 = vsub.f32 %v613_v50, %v678_v29  ;;  %v740_v63 = vmul.f32 %v708_v30, %v676_v34  ;;  %v400_v33 = vld [vmem:[#allocation2 + $0x129] sm:$0xff]  ;;  %v524_v44 = vld [vmem:[#allocation2 + $0xfb] sm:$0xff]  ;;  %v1080_v1 = vld [vmem:[#allocation3 + $0x112] sm:$0xff] }
  0x61   :  { %v769_v56 = vadd.f32 %v768_v46, %v738_v21  ;;  %v430_v60 = vadd.f32 %v398_v7, %v969_v49  ;;  %v492_v41 = vadd.f32 %v460_v22, %v428_v28  ;;  %v554_v31 = vadd.f32 %v522_v40, %v490_v45  ;;  %v401_v2 = vld [vmem:[#allocation2 + $0x139] sm:$0xff]  ;;  %v463_v50 = vld [vmem:[#allocation2 + $0x122] sm:$0xff]  ;;  %v525_v17 = vld [vmem:[#allocation2 + $0x10b] sm:$0xff] }
  0x62   :  { %v616_v32 = vadd.f32 %v584_v14, %v552_v39  ;;  %v681_v24 = vand.u32 2147483647, %v1072_v23  ;;  %v711_v6 = vsub.f32 %v614_v3, %v679_v5  ;;  %v741_v47 = vmul.f32 %v709_v25, %v677_v9  ;;  %v588_v28 = vld [vmem:[#allocation2 + $0xfc] sm:$0xff]  ;;  %v464_v14 = vld [vmem:[#allocation2 + $0x12a] sm:$0xff]  ;;  %v526_v3 = vld [vmem:[#allocation2 + $0x113] sm:$0xff] }
  0x63   :  { %v770_v36 = vadd.f32 %v769_v56, %v739_v48  ;;  %v431_v10 = vadd.f32 %v399_v53, %v973_v61  ;;  %v493_v34 = vadd.f32 %v461_v58, %v429_v15  ;;  %v555_v13 = vadd.f32 %v523_v18, %v491_v27  ;;  %v1084_v45 = vld [vmem:[#allocation3 + $0x122] sm:$0xff]  ;;  %v589_v46 = vld [vmem:[#allocation2 + $0x10c] sm:$0xff]  ;;  %v1092_v56 = vld [vmem:[#allocation3 + $0x13a] sm:$0xff] }
  0x64   :  { %v617_v49 = vadd.f32 %v585_v52, %v553_v43  ;;  %v682_v37 = vand.u32 2147483647, %v1076_v62  ;;  %v712_v19 = vsub.f32 %v615_v11, %v680_v59  ;;  %v742_v51 = vmul.f32 %v710_v20, %v678_v29  ;;  %v402_v39 = vld [vmem:[#allocation2 + $0x141] sm:$0xff]  ;;  %v1088_v15 = vld [vmem:[#allocation3 + $0x12a] sm:$0xff] }
  0x65   :  { %v771_v30 = vadd.f32 %v770_v36, %v740_v63  ;;  %v432_v21 = vadd.f32 %v400_v33, %v975_v55  ;;  %v494_v9 = vadd.f32 %v462_v4, %v430_v60  ;;  %v556_v0 = vadd.f32 %v524_v44, %v492_v41  ;;  %v403_v27 = vld [vmem:[#allocation2 + $0x151] sm:$0xff]  ;;  %v465_v43 = vld [vmem:[#allocation2 + $0x13a] sm:$0xff]  ;;  %v527_v52 = vld [vmem:[#allocation2 + $0x123] sm:$0xff] }
  0x66   :  { %v618_v61 = vadd.f32 %v586_v57, %v554_v31  ;;  %v683_v35 = vand.u32 2147483647, %v1080_v1  ;;  %v713_v7 = vsub.f32 %v616_v32, %v681_v24  ;;  %v743_v22 = vmul.f32 %v711_v6, %v679_v5  ;;  %v590_v63 = vld [vmem:[#allocation2 + $0x114] sm:$0xff]  ;;  %v466_v41 = vld [vmem:[#allocation2 + $0x142] sm:$0xff]  ;;  %v528_v31 = vld [vmem:[#allocation2 + $0x12b] sm:$0xff] }
  0x67   :  { %v772_v40 = vadd.f32 %v771_v30, %v741_v47  ;;  %v433_v25 = vadd.f32 %v401_v2, %v979_v8  ;;  %v495_v29 = vadd.f32 %v463_v50, %v431_v10  ;;  %v557_v48 = vadd.f32 %v525_v17, %v493_v34  ;;  %v404_v60 = vld [vmem:[#allocation2 + $0x159] sm:$0xff]  ;;  %v591_v6 = vld [vmem:[#allocation2 + $0x124] sm:$0xff]  ;;  %v592_v17 = vld [vmem:[#allocation2 + $0x12c] sm:$0xff] }
  0x68   :  { %v619_v55 = vadd.f32 %v587_v54, %v555_v13  ;;  %v684_v11 = vand.u32 2147483647, %v1084_v45  ;;  %v714_v23 = vsub.f32 %v617_v49, %v682_v37  ;;  %v744_v53 = vmul.f32 %v712_v19, %v680_v59  ;;  %v1096_v47 = vld [vmem:[#allocation3 + $0x142] sm:$0xff]  ;;  %v467_v10 = vld [vmem:[#allocation2 + $0x152] sm:$0xff]  ;;  %v468_v30 = vld [vmem:[#allocation2 + $0x15a] sm:$0xff] }
  0x69   :  { %v773_v58 = vadd.f32 %v772_v40, %v742_v51  ;;  %v434_v18 = vadd.f32 %v402_v39, %v981_v12  ;;  %v496_v5 = vadd.f32 %v464_v14, %v432_v21  ;;  %v558_v20 = vadd.f32 %v526_v3, %v494_v9  ;;  %v405_v36 = vld [vmem:[#allocation2 + $0x169] sm:$0xff]  ;;  %v529_v34 = vld [vmem:[#allocation2 + $0x13b] sm:$0xff]  ;;  %v656_v19 = vld [vmem:[#allocation3 + $0x152] sm:$0xff] }
  0x6a   :  { %v620_v8 = vadd.f32 %v588_v28, %v556_v0  ;;  %v685_v57 = vand.u32 2147483647, %v1088_v15  ;;  %v715_v32 = vsub.f32 %v618_v61, %v683_v35  ;;  %v745_v62 = vmul.f32 %v713_v7, %v681_v24  ;;  %v406_v51 = vld [vmem:[#allocation2 + $0x171] sm:$0xff]  ;;  %v530_v21 = vld [vmem:[#allocation2 + $0x143] sm:$0xff]  ;;  %v657_v3 = vld [vmem:[#allocation3 + $0x15a] sm:$0xff] }
  0x6b   :  { %v774_v33 = vadd.f32 %v773_v58, %v743_v22  ;;  %v435_v4 = vadd.f32 %v403_v27, %v985_v16  ;;  %v497_v59 = vadd.f32 %v465_v43, %v433_v25  ;;  %v559_v44 = vadd.f32 %v527_v52, %v495_v29  ;;  %v531_v7 = vld [vmem:[#allocation2 + $0x153] sm:$0xff]  ;;  %v593_v22 = vld [vmem:[#allocation2 + $0x13c] sm:$0xff] }
  0x6c   :  { %v621_v12 = vadd.f32 %v589_v46, %v557_v48  ;;  %v686_v13 = vand.u32 2147483647, %v1092_v56  ;;  %v716_v54 = vsub.f32 %v619_v55, %v684_v11  ;;  %v746_v49 = vmul.f32 %v714_v23, %v682_v37  ;;  %v470_v43 = vld [vmem:[#allocation2 + $0x172] sm:$0xff]  ;;  %v532_v52 = vld [vmem:[#allocation2 + $0x15b] sm:$0xff] }
  0x6d   :  { %v775_v1 = vadd.f32 %v774_v33, %v744_v53  ;;  %v436_v2 = vadd.f32 %v404_v60, %v987_v42  ;;  %v498_v24 = vadd.f32 %v466_v41, %v434_v18  ;;  %v560_v50 = vadd.f32 %v528_v31, %v496_v5  ;;  %v469_v42 = vld [vmem:[#allocation2 + $0x16a] sm:$0xff]  ;;  %v595_v56 = vld [vmem:[#allocation2 + $0x154] sm:$0xff] }
  0x6e   :  { %v622_v16 = vadd.f32 %v590_v63, %v558_v20  ;;  %v687_v9 = vand.u32 2147483647, %v1096_v47  ;;  %v717_v0 = vsub.f32 %v620_v8, %v685_v57  ;;  %v747_v28 = vmul.f32 %v715_v32, %v683_v35  ;;  %v658_v35 = vld [vmem:[#allocation3 + $0x16a] sm:$0xff]  ;;  %v659_v8 = vld [vmem:[#allocation3 + $0x172] sm:$0xff] }
  0x6f   :  { %v776_v61 = vadd.f32 %v775_v1, %v745_v62  ;;  %v437_v45 = vadd.f32 %v405_v36, %v991_v38  ;;  %v499_v39 = vadd.f32 %v467_v10, %v435_v4  ;;  %v561_v37 = vadd.f32 %v529_v34, %v497_v59  ;;  %v594_v38 = vld [vmem:[#allocation2 + $0x144] sm:$0xff]  ;;  %v596_v59 = vld [vmem:[#allocation2 + $0x15c] sm:$0xff]  ;;  %v534_v36 = vld [vmem:[#allocation2 + $0x173] sm:$0xff] }
  0x70   :  { %v623_v14 = vadd.f32 %v591_v6, %v559_v44  ;;  %v688_v40 = vand.u32 2147483647, %v656_v19  ;;  %v718_v25 = vsub.f32 %v621_v12, %v686_v13  ;;  %v748_v29 = vmul.f32 %v716_v54, %v684_v11  ;;  %v660_v11 = vld [vmem:[#allocation3 + $0x182] sm:$0xff]  ;;  %v533_v62 = vld [vmem:[#allocation2 + $0x16b] sm:$0xff] }
  0x71   :  { %v777_v48 = vadd.f32 %v776_v61, %v746_v49  ;;  %v438_v46 = vadd.f32 %v406_v51, %v993_v26  ;;  %v500_v55 = vadd.f32 %v468_v30, %v436_v2  ;;  %v562_v15 = vadd.f32 %v530_v21, %v498_v24  ;;  %v661_v44 = vld [vmem:[#allocation3 + $0x18a] sm:$0xff]  ;;  %v662_v49 = vld [vmem:[#allocation3 + $0x19a] sm:$0xff]  ;;  %v663_v19 = vld [vmem:[#allocation3 + $0x1a2] sm:$0xff] }
  0x72   :  { %v624_v27 = vadd.f32 %v592_v17, %v560_v50  ;;  %v689_v23 = vand.u32 2147483647, %v657_v3  ;;  %v719_v53 = vsub.f32 %v622_v16, %v687_v9  ;;  %v749_v58 = vmul.f32 %v717_v0, %v685_v57  ;;  %v598_v0 = vld [vmem:[#allocation2 + $0x174] sm:$0xff] }
  0x73   :  { %v778_v18 = vadd.f32 %v777_v48, %v747_v28  ;;  %v501_v5 = vadd.f32 %v469_v42, %v437_v45  ;;  %v563_v20 = vadd.f32 %v531_v7, %v499_v39  ;;  %v625_v63 = vadd.f32 %v593_v22, %v561_v37 }
  0x74   :  { %v690_v60 = vand.u32 2147483647, %v658_v35  ;;  %v720_v41 = vsub.f32 %v623_v14, %v688_v40  ;;  %v750_v26 = vmul.f32 %v718_v25, %v686_v13  ;;  %v502_v32 = vadd.f32 %v470_v43, %v438_v46  ;;  %v597_v13 = vld [vmem:[#allocation2 + $0x16c] sm:$0xff] }
  0x75   :  { %v779_v31 = vadd.f32 %v778_v18, %v748_v29  ;;  %v564_v33 = vadd.f32 %v532_v52, %v500_v55  ;;  %v626_v4 = vadd.f32 %v594_v38, %v562_v15  ;;  %v691_v6 = vand.u32 2147483647, %v659_v8 }
  0x76   :  { %v721_v12 = vsub.f32 %v624_v27, %v689_v23  ;;  %v751_v57 = vmul.f32 %v719_v53, %v687_v9  ;;  %v627_v10 = vadd.f32 %v595_v56, %v563_v20  ;;  %v692_v34 = vand.u32 2147483647, %v660_v11 }
  0x77   :  { %v780_v47 = vadd.f32 %v779_v31, %v749_v58  ;;  %v565_v54 = vadd.f32 %v533_v62, %v501_v5  ;;  %v722_v1 = vsub.f32 %v625_v63, %v690_v60  ;;  %v752_v2 = vmul.f32 %v720_v41, %v688_v40 }
  0x78   :  { %v628_v50 = vadd.f32 %v596_v59, %v564_v33  ;;  %v693_v17 = vand.u32 2147483647, %v661_v44  ;;  %v566_v16 = vadd.f32 %v534_v36, %v502_v32  ;;  %v723_v51 = vsub.f32 %v626_v4, %v691_v6 }
  0x79   :  { %v781_v24 = vadd.f32 %v780_v47, %v750_v26  ;;  %v753_v30 = vmul.f32 %v721_v12, %v689_v23  ;;  %v694_v28 = vand.u32 2147483647, %v662_v49  ;;  %v629_v9 = vadd.f32 %v597_v13, %v565_v54 }
  0x7a   :  { %v724_v61 = vsub.f32 %v627_v10, %v692_v34  ;;  %v754_v45 = vmul.f32 %v722_v1, %v690_v60  ;;  %v695_v37 = vand.u32 2147483647, %v663_v19  ;;  %v630_v14 = vadd.f32 %v598_v0, %v566_v16 }
  0x7b   :  { %v782_v21 = vadd.f32 %v781_v24, %v751_v57  ;;  %v725_v3 = vsub.f32 %v628_v50, %v693_v17  ;;  %v755_v42 = vmul.f32 %v723_v51, %v691_v6  ;;  %v726_v22 = vsub.f32 %v629_v9, %v694_v28 }
  0x7c   :  { %v756_v40 = vmul.f32 %v724_v61, %v692_v34  ;;  %v727_v29 = vsub.f32 %v630_v14, %v695_v37 }
  0x7d   :  { %v783_v39 = vadd.f32 %v782_v21, %v752_v2  ;;  %v757_v48 = vmul.f32 %v725_v3, %v693_v17  ;;  %v758_v55 = vmul.f32 %v726_v22, %v694_v28 }
  0x7e   :  { %v759_v27 = vmul.f32 %v727_v29, %v695_v37 }
  0x7f   :  { %v784_v7 = vadd.f32 %v783_v39, %v753_v30 }
  0x81   :  { %v785_v25 = vadd.f32 %v784_v7, %v754_v45 }
  0x83   :  { %v786_v46 = vadd.f32 %v785_v25, %v755_v42 }
  0x85   :  { %v787_v15 = vadd.f32 %v786_v46, %v756_v40 }
  0x87   :  { %v788_v35 = vadd.f32 %v787_v15, %v757_v48 }
  0x89   :  { %v789_v43 = vadd.f32 %v788_v35, %v758_v55 }
  0x8b   :  { %v790_v52 = vadd.f32 %v789_v43, %v759_v27 }
  0x8d   :  { %791 = vadd.xlane.f32.xlu0 %v790_v52 }
 0x100   :  { %v792_v38 = vpop.xlane.xlu0 %791 }
 0x101   :  { %v793_v23 = vrot.slane %v792_v38, 4 }
 0x103   :  { %v794_v53 = vadd.f32 %v793_v23, %v792_v38 }
 0x105   :  { %v795_v58 = vrot.slane %v794_v53, 2 }
 0x107   :  { %v796_v18 = vadd.f32 %v795_v58, %v794_v53 }
 0x109   :  { %v797_v5 = vrot.slane %v796_v18, 1 }
 0x10b   :  { %v798_v20 = vadd.f32 %v797_v5, %v796_v18 }
 0x10d   :  { %819 = vpush %v798_v20 }
 0x13e   :  { %s820_s17 = spop %819 }
 0x13f   :  { %v800_v63 = vstv %s820_s17 }
 0x140   :  { %801 = vst [vmem:[#allocation6] sm:$0xff] %v800_v63 }
 0x141   :  { %812 = dma.vmem_to_hbm [thread:$0]  %s808_s13, 128, %s810_s16, [#allocation5]  }
 0x142   :  { %875 = dma.done.wait [#allocation5], 128  }
 0x143   :  { %876 = vsyncadd [#allocation5], 4294967168 }
 0x144   :  { %817 = vsyncpa [#allocation4], 1 }
 0x145   :  { %818 = vsyncpa [#allocation5], 1 }

</bundles_post_ra>
